<compile_context>
chip_gen: v5e
topology: v5e:2x2
jax: 0.10.0
libtpu: 0.0.40
codegen_flags: <defaults>
</compile_context>

<pallas_src>
import functools

import jax
import jax.numpy as jnp
import numpy as np
from jax.experimental import pallas as pl
from jax.experimental.pallas import tpu as pltpu

LANE = 128
SUBLANE = 8


def _round_up(x, m):
    return (x + m - 1) // m * m


# ----------------------------------------------------------------------------
# Pallas kernel: diffeq forward + Hutchinson divergence (analytic VJP).
# ----------------------------------------------------------------------------
def _odefunc_kernel(t_ref, y_ref, e_ref, w1_ref, b1_ref, wt_ref,
                    w2_ref, wcat_ref, b2_ref,
                    dy_ref, negdiv_ref, *, residual, feat_dim, hp):
    t = t_ref[0, 0]                       # scalar time (SMEM)
    y = y_ref[...]                        # (TB, Dp) f32
    e_bf = e_ref[...]                     # (TB, Dp) bf16 (prepared once per odeint)
    y_bf = y.astype(jnp.bfloat16)         # bf16 operands only for the MXU

    # diffeq forward: dy = tanh(y W1 + b1 + t*wt) W2 + b2   (f32 accumulation)
    pre = jnp.dot(y_bf, w1_ref[...], preferred_element_type=jnp.float32) \
        + b1_ref[...] + t * wt_ref[...]
    h = jnp.tanh(pre)                                             # (TB, Hp) f32
    dy = jnp.dot(h.astype(jnp.bfloat16), w2_ref[...],
                 preferred_element_type=jnp.float32) + b2_ref[...]

    # divergence_approx, rewritten so no (TB, D) temporary or W1^T appears:
    #   div_row = ((e W2^T) * (1 - h^2)) . (e W1)
    # Single e-matmul against the resident [W1 | W2^T] concat (N = 2*Hp = 256
    # fills the v6e/v7x MXU); the halves are lane-tile aligned static slices.
    ue = jnp.dot(e_bf, wcat_ref[...], preferred_element_type=jnp.float32)
    u = ue[:, :hp]                        # e @ W1
    g = ue[:, hp:] * (1.0 - h * h)        # (e @ W2^T) * tanh'(pre)
    div = jnp.sum(g * u, axis=1, keepdims=True)                   # (TB, 1) f32

    if residual:
        dy = dy - y                       # y kept f32 -> exact residual subtract
        div = div - jnp.float32(feat_dim)

    dy_ref[...] = dy.astype(dy_ref.dtype)
    # Minimal writeback: a single f32 column (flash-attn lse pattern), instead
    # of broadcasting to 128 lanes.
    negdiv_ref[...] = (-div).astype(negdiv_ref.dtype)


def _build_call(B_pad, Dp, Hp, TB, residual, feat_dim):
    grid = (B_pad // TB,)
    kernel = functools.partial(_odefunc_kernel, residual=residual,
                               feat_dim=feat_dim, hp=Hp)
    smem = pl.BlockSpec((1, 1), lambda i: (0, 0),
                        memory_space=pltpu.MemorySpace.SMEM)
    row_spec = pl.BlockSpec((TB, Dp), lambda i: (i, 0))

    def const(shape):
        return pl.BlockSpec(shape, lambda i: (0, 0))

    # VMEM budget: double-buffered batch tiles + resident weights + headroom
    # for the elementwise temporaries (pre/h/ue/g/u).
    vmem_bytes = (
        2 * TB * Dp * 4                                  # y tiles (f32)
        + 2 * TB * Dp * 2                                # e tiles (bf16)
        + 2 * TB * Dp * 4                                # dy tiles (f32)
        + 2 * TB * 4                                     # negdiv tiles
        + 2 * (Dp * Hp + Hp * Dp + Dp * 2 * Hp) * 2      # W1, W2, [W1|W2^T] bf16
        + 2 * (2 * Hp + Dp) * 4                          # b1, wt, b2
        + 16 * TB * Hp * 4                               # temporaries headroom
    )
    # Cap near 40 MiB: leaves compiler-scratch headroom on v7x (64 MiB VMEM);
    # plenty conservative for v5e/v6e (128 MiB).
    vmem_limit = int(min(max(2 * vmem_bytes, 8 << 20), 40 << 20))

    return pl.pallas_call(
        kernel,
        out_shape=(jax.ShapeDtypeStruct((B_pad, Dp), jnp.float32),
                   jax.ShapeDtypeStruct((B_pad, 1), jnp.float32)),
        grid=grid,
        in_specs=[smem,                    # t
                  row_spec,                # y  (f32, tiled over batch)
                  row_spec,                # e  (bf16, tiled over batch)
                  const((Dp, Hp)),         # W1        (resident, constant index)
                  const((1, Hp)),          # b1
                  const((1, Hp)),          # wt
                  const((Hp, Dp)),         # W2
                  const((Dp, 2 * Hp)),     # [W1 | W2^T]
                  const((1, Dp))],         # b2
        out_specs=(row_spec,
                   pl.BlockSpec((TB, 1), lambda i: (i, 0))),
        compiler_params=pltpu.CompilerParams(
            dimension_semantics=("parallel",),
            vmem_limit_bytes=vmem_limit),
    )


# ----------------------------------------------------------------------------
# Module-level wrapper mirroring the PyTorch ODEfunc API.
# ----------------------------------------------------------------------------
class ODEfuncPallas:
    def __init__(self, params, residual=False, rademacher=False):
        w1, b1, wt, w2, b2 = [jnp.asarray(p, jnp.float32) for p in params]
        D, HID = int(w1.shape[0]), int(w1.shape[1])
        self.D = D
        self.Dp = _round_up(D, LANE)
        self.Hp = _round_up(HID, LANE)

        # Pad to lane multiples, cast MXU operands to bf16, build [W1 | W2^T]
        # — all paid once here, never per ODE evaluation.
        if (D, HID) != (self.Dp, self.Hp):
            w1p = jnp.zeros((self.Dp, self.Hp), jnp.float32).at[:D, :HID].set(w1)
            w2p = jnp.zeros((self.Hp, self.Dp), jnp.float32).at[:HID, :D].set(w2)
        else:
            w1p, w2p = w1, w2
        self.w1 = w1p.astype(jnp.bfloat16)
        self.w2 = w2p.astype(jnp.bfloat16)
        self.wcat = jnp.concatenate([w1p, w2p.T], axis=1).astype(jnp.bfloat16)
        self.b1 = jnp.zeros((1, self.Hp), jnp.float32).at[:, :HID].set(
            b1.reshape(1, -1))
        self.wt = jnp.zeros((1, self.Hp), jnp.float32).at[:, :HID].set(
            wt.reshape(1, -1))
        self.b2 = jnp.zeros((1, self.Dp), jnp.float32).at[:, :D].set(
            b2.reshape(1, -1))

        self.residual = residual
        self.rademacher = rademacher
        self._e = None
        self._e_prepared = None
        self._e_key = None
        self._num_evals = 0.0
        self._rng = jax.random.PRNGKey(1234)
        self._call_cache = {}

    # -- PyTorch-API mirrors --------------------------------------------------
    def before_odeint(self, e=None):
        self._e = e
        self._e_prepared = None
        self._e_key = None
        self._num_evals = 0.0

    def num_evals(self):
        # TODO(synk): counted in Python; will not track evals if forward() is
        # jitted or driven from a scan-based solver (unlike the torch buffer).
        return self._num_evals

    # -- batch tiling ----------------------------------------------------------
    def _choose_tiling(self, B):
        # Prefer large tiles that split the batch evenly into >= 2 grid steps:
        # amortizes ~0.35 us/step overhead and keeps both v7x TensorCores busy.
        for TB in (512, 384, 256, 128):
            if B % TB == 0 and B // TB >= 2:
                return B, TB
        if B % 16 == 0 and B >= 32:
            return B, B // 2                  # two tiles of multiple-of-8 rows
        if B % SUBLANE == 0 and B <= 2048:
            return B, B                       # single full-array tile, no pad
        if B <= 2048:
            Bp = _round_up(B, SUBLANE)        # tiny / ragged batch: pad rows
            return Bp, Bp
        return _round_up(B, 256), 256         # large ragged batch: pad + tile

    def _get_call(self, B_pad, TB):
        key = (B_pad, TB)
        if key not in self._call_cache:
            self._call_cache[key] = _build_call(
                B_pad, self.Dp, self.Hp, TB, self.residual, self.D)
        return self._call_cache[key]

    def _prepare_e(self, y, B_pad):
        """Sample / pad / cast the Hutchinson probe ONCE per odeint call.

        e is constant across every ODE eval of a solve, so the pad + bf16 cast
        is amortized over all evals and the kernel streams e at 2 B/elem.
        """
        key = (B_pad,) + tuple(y.shape)
        if self._e_prepared is not None and self._e_key == key:
            return self._e_prepared
        if self._e is None:
            self._rng, sub = jax.random.split(self._rng)
            if self.rademacher:
                self._e = (jax.random.randint(sub, y.shape, 0, 2)
                           .astype(jnp.float32) * 2 - 1)
            else:
                self._e = jax.random.normal(sub, y.shape, dtype=jnp.float32)
        B = y.shape[0]
        e_flat = jnp.asarray(self._e, jnp.float32).reshape(B, -1)
        if B_pad != B or self.Dp != self.D:
            e_flat = jnp.zeros((B_pad, self.Dp), jnp.float32).at[
                :B, :self.D].set(e_flat)
        self._e_prepared = e_flat.astype(jnp.bfloat16)
        self._e_key = key
        return self._e_prepared

    # -- forward ---------------------------------------------------------------
    def forward(self, t, states):
        assert len(states) >= 2
        y = states[0]                                 # (B, C, H, W) or (B, D)
        self._num_evals += 1
        B = y.shape[0]
        y_flat = jnp.asarray(y, jnp.float32).reshape(B, -1)
        assert y_flat.shape[1] == self.D

        B_pad, TB = self._choose_tiling(B)
        e_in = self._prepare_e(y, B_pad)              # (B_pad, Dp) bf16, cached

        # y streams straight through (no per-eval pad copy) whenever shapes are
        # already tile-friendly — the common case for D % 128 == 0.
        if B_pad != B or self.Dp != self.D:
            y_in = jnp.zeros((B_pad, self.Dp), jnp.float32).at[
                :B, :self.D].set(y_flat)
        else:
            y_in = y_flat
        t_arr = jnp.asarray(t, jnp.float32).reshape(1, 1)

        call = self._get_call(B_pad, TB)
        dy_p, negdiv_p = call(t_arr, y_in, e_in, self.w1, self.b1, self.wt,
                              self.w2, self.wcat, self.b2)

        dy = dy_p[:B, :self.D].reshape(y.shape)
        negdiv = negdiv_p[:B]
        extras = [jnp.zeros_like(s) for s in states[2:]]
        # TODO(synk): brute-force divergence path (divergence_bf, used at eval
        # time when feature dim == 2) not reproduced; approximate path only.
        return tuple([dy, negdiv] + extras)


# ----------------------------------------------------------------------------
# Pure-JAX f32 reference (jax.vjp, mirrors torch.autograd.grad semantics).
# ----------------------------------------------------------------------------
def _reference(t, y_flat, e_flat, w1, b1, wt, w2, b2, residual):
    def diffeq(yy):
        h = jnp.tanh(yy @ w1 + b1 + t * wt)
        return h @ w2 + b2

    dy = diffeq(y_flat)
    _, vjp_fn = jax.vjp(diffeq, y_flat)
    e_dzdx = vjp_fn(e_flat)[0]
    div = jnp.sum(e_dzdx * e_flat, axis=1, keepdims=True)
    if residual:
        dy = dy - y_flat
        div = div - y_flat.shape[1]
    return dy, -div


if __name__ == "__main__":
    key = jax.random.PRNGKey(0)
    kb = jax.random.split(key, 8)

    # Small, module-consistent shapes: NCHW input (B=2, C=4, H=8, W=8) -> D=256
    B, C, H, W = 2, 4, 8, 8
    D = C * H * W
    HID = 64

    y = jax.random.normal(kb[0], (B, C, H, W), dtype=jnp.float32)
    logp = jnp.zeros((B, 1), dtype=jnp.float32)

    # Deterministic diffeq parameters (synthetic, not a checkpoint).
    w1 = jax.random.normal(kb[1], (D, HID), dtype=jnp.float32) * 0.05
    b1 = jax.random.normal(kb[2], (1, HID), dtype=jnp.float32) * 0.01
    wt = jax.random.normal(kb[3], (1, HID), dtype=jnp.float32) * 0.01
    w2 = jax.random.normal(kb[4], (HID, D), dtype=jnp.float32) * 0.05
    b2 = jax.random.normal(kb[5], (1, D), dtype=jnp.float32) * 0.01

    e = jax.random.normal(kb[6], (B, C, H, W), dtype=jnp.float32)
    t = 0.3

    # --- approximate-divergence path (default) ---
    ode = ODEfuncPallas((w1, b1, wt, w2, b2), residual=False, rademacher=False)
    ode.before_odeint(e=e)
    dy, negdiv = ode.forward(t, (y, logp))
    # Second eval reuses the cached bf16 probe and compiled call (odeint path).
    dy2, negdiv2 = ode.forward(t + 0.1, (y, logp))
    jax.block_until_ready((dy, negdiv, dy2, negdiv2))

    dy_ref, negdiv_ref = _reference(
        jnp.float32(t), y.reshape(B, -1), e.reshape(B, -1),
        w1, b1, wt, w2, b2, residual=False)
    assert dy.shape == y.shape and negdiv.shape == (B, 1)
    assert np.allclose(np.asarray(dy).reshape(B, -1), np.asarray(dy_ref),
                       rtol=2e-2, atol=2e-2)
    assert np.allclose(np.asarray(negdiv), np.asarray(negdiv_ref),
                       rtol=5e-2, atol=2.5e-1)

    # --- residual variant exercises the in-kernel residual branch ---
    ode_r = ODEfuncPallas((w1, b1, wt, w2, b2), residual=True, rademacher=False)
    ode_r.before_odeint(e=e)
    dy_r, negdiv_r = ode_r.forward(t, (y, logp))
    jax.block_until_ready((dy_r, negdiv_r))
    dy_rref, negdiv_rref = _reference(
        jnp.float32(t), y.reshape(B, -1), e.reshape(B, -1),
        w1, b1, wt, w2, b2, residual=True)
    assert np.allclose(np.asarray(dy_r).reshape(B, -1), np.asarray(dy_rref),
                       rtol=2e-2, atol=2e-2)
    assert np.allclose(np.asarray(negdiv_r), np.asarray(negdiv_rref),
                       rtol=5e-2, atol=2.5e-1)

    print("KERNEL_OK")
</pallas_src>

<mosaic_0001>
module attributes {stable_mosaic.version = 11 : i64} {
  func.func @_odefunc_kernel(%arg0: i32, %arg1: memref<1x1xf32, #tpu.memory_space<smem>>, %arg2: memref<8x256xf32, #tpu.memory_space<vmem>>, %arg3: memref<8x256xbf16, #tpu.memory_space<vmem>>, %arg4: memref<256x128xbf16, #tpu.memory_space<vmem>>, %arg5: memref<1x128xf32, #tpu.memory_space<vmem>>, %arg6: memref<1x128xf32, #tpu.memory_space<vmem>>, %arg7: memref<128x256xbf16, #tpu.memory_space<vmem>>, %arg8: memref<256x256xbf16, #tpu.memory_space<vmem>>, %arg9: memref<1x256xf32, #tpu.memory_space<vmem>>, %arg10: memref<8x256xf32, #tpu.memory_space<vmem>>, %arg11: memref<8x1xf32, #tpu.memory_space<vmem>>) attributes {dimension_semantics = [#tpu.dimension_semantics<parallel>], iteration_bounds = array<i64: 1>, scalar_prefetch = 0 : i64, scratch_operands = 0 : i64, tpu.core_type = #tpu.core_type<tc>, window_params = [{transform_indices = @transform_0, window_bounds = array<i64: 1, 1>}, {transform_indices = @transform_1, window_bounds = array<i64: 8, 256>}, {transform_indices = @transform_2, window_bounds = array<i64: 8, 256>}, {pipeline_mode = #tpu.pipeline_mode<synchronous>, transform_indices = @transform_3, window_bounds = array<i64: 256, 128>}, {pipeline_mode = #tpu.pipeline_mode<synchronous>, transform_indices = @transform_4, window_bounds = array<i64: 1, 128>}, {pipeline_mode = #tpu.pipeline_mode<synchronous>, transform_indices = @transform_5, window_bounds = array<i64: 1, 128>}, {pipeline_mode = #tpu.pipeline_mode<synchronous>, transform_indices = @transform_6, window_bounds = array<i64: 128, 256>}, {pipeline_mode = #tpu.pipeline_mode<synchronous>, transform_indices = @transform_7, window_bounds = array<i64: 256, 256>}, {pipeline_mode = #tpu.pipeline_mode<synchronous>, transform_indices = @transform_8, window_bounds = array<i64: 1, 256>}, {transform_indices = @transform_9, window_bounds = array<i64: 8, 256>}, {transform_indices = @transform_10, window_bounds = array<i64: 8, 1>}]} {
    %c0 = arith.constant 0 : index
    %c0_0 = arith.constant 0 : index
    %0 = memref.load %arg1[%c0, %c0_0] : memref<1x1xf32, #tpu.memory_space<smem>>
    %c0_1 = arith.constant 0 : index
    %c0_2 = arith.constant 0 : index
    %1 = vector.load %arg2[%c0_1, %c0_2] : memref<8x256xf32, #tpu.memory_space<vmem>>, vector<8x256xf32>
    %c0_3 = arith.constant 0 : index
    %c0_4 = arith.constant 0 : index
    %2 = vector.load %arg3[%c0_3, %c0_4] : memref<8x256xbf16, #tpu.memory_space<vmem>>, vector<8x256xbf16>
    %3 = arith.truncf %1 : vector<8x256xf32> to vector<8x256xbf16>
    %c0_5 = arith.constant 0 : index
    %c0_6 = arith.constant 0 : index
    %4 = vector.load %arg4[%c0_5, %c0_6] : memref<256x128xbf16, #tpu.memory_space<vmem>>, vector<256x128xbf16>
    %cst = arith.constant dense<0.000000e+00> : vector<8x128xf32>
    %5 = tpu.matmul %3, %4, %cst {dimension_numbers = #tpu.dot_dimension_numbers<[1], [0], [0], [1], [0, 0, 1, 1], [], []>} : vector<8x256xbf16>, vector<256x128xbf16>, vector<8x128xf32> -> vector<8x128xf32>
    %c0_7 = arith.constant 0 : index
    %c0_8 = arith.constant 0 : index
    %6 = vector.load %arg5[%c0_7, %c0_8] : memref<1x128xf32, #tpu.memory_space<vmem>>, vector<1x128xf32>
    %7 = vector.broadcast %6 : vector<1x128xf32> to vector<8x128xf32>
    %8 = arith.addf %5, %7 : vector<8x128xf32>
    %c0_9 = arith.constant 0 : index
    %c0_10 = arith.constant 0 : index
    %9 = vector.load %arg6[%c0_9, %c0_10] : memref<1x128xf32, #tpu.memory_space<vmem>>, vector<1x128xf32>
    %10 = vector.broadcast %0 : f32 to vector<1x128xf32>
    %11 = arith.mulf %10, %9 : vector<1x128xf32>
    %12 = vector.broadcast %11 : vector<1x128xf32> to vector<8x128xf32>
    %13 = arith.addf %8, %12 : vector<8x128xf32>
    %14 = math.tanh %13 : vector<8x128xf32>
    %15 = arith.truncf %14 : vector<8x128xf32> to vector<8x128xbf16>
    %c0_11 = arith.constant 0 : index
    %c0_12 = arith.constant 0 : index
    %16 = vector.load %arg7[%c0_11, %c0_12] : memref<128x256xbf16, #tpu.memory_space<vmem>>, vector<128x256xbf16>
    %cst_13 = arith.constant dense<0.000000e+00> : vector<8x256xf32>
    %17 = tpu.matmul %15, %16, %cst_13 {dimension_numbers = #tpu.dot_dimension_numbers<[1], [0], [0], [1], [0, 0, 1, 1], [], []>} : vector<8x128xbf16>, vector<128x256xbf16>, vector<8x256xf32> -> vector<8x256xf32>
    %c0_14 = arith.constant 0 : index
    %c0_15 = arith.constant 0 : index
    %18 = vector.load %arg9[%c0_14, %c0_15] : memref<1x256xf32, #tpu.memory_space<vmem>>, vector<1x256xf32>
    %19 = vector.broadcast %18 : vector<1x256xf32> to vector<8x256xf32>
    %20 = arith.addf %17, %19 : vector<8x256xf32>
    %c0_16 = arith.constant 0 : index
    %c0_17 = arith.constant 0 : index
    %21 = vector.load %arg8[%c0_16, %c0_17] : memref<256x256xbf16, #tpu.memory_space<vmem>>, vector<256x256xbf16>
    %cst_18 = arith.constant dense<0.000000e+00> : vector<8x256xf32>
    %22 = tpu.matmul %2, %21, %cst_18 {dimension_numbers = #tpu.dot_dimension_numbers<[1], [0], [0], [1], [0, 0, 1, 1], [], []>} : vector<8x256xbf16>, vector<256x256xbf16>, vector<8x256xf32> -> vector<8x256xf32>
    %23 = vector.extract_strided_slice %22 {offsets = [0, 0], sizes = [8, 128], strides = [1, 1]} : vector<8x256xf32> to vector<8x128xf32>
    %24 = vector.extract_strided_slice %22 {offsets = [0, 128], sizes = [8, 128], strides = [1, 1]} : vector<8x256xf32> to vector<8x128xf32>
    %25 = arith.mulf %14, %14 : vector<8x128xf32>
    %cst_19 = arith.constant 1.000000e+00 : f32
    %26 = vector.broadcast %cst_19 : f32 to vector<8x128xf32>
    %27 = arith.subf %26, %25 : vector<8x128xf32>
    %28 = arith.mulf %24, %27 : vector<8x128xf32>
    %29 = arith.mulf %28, %23 : vector<8x128xf32>
    %cst_20 = arith.constant dense<0.000000e+00> : vector<8xf32>
    %30 = vector.multi_reduction <add>, %29, %cst_20 [1] : vector<8x128xf32> to vector<8xf32>
    %31 = vector.shape_cast %30 : vector<8xf32> to vector<8x1xf32>
    %c0_21 = arith.constant 0 : index
    %c0_22 = arith.constant 0 : index
    %32 = vector.load %arg10[%c0_21, %c0_22] : memref<8x256xf32, #tpu.memory_space<vmem>>, vector<8x256xf32>
    tpu.vector_store %arg10[%c0_21, %c0_22], %20 {strides = array<i32>} : memref<8x256xf32, #tpu.memory_space<vmem>>, vector<8x256xf32>,
    %cst_23 = arith.constant 0.000000e+00 : f32
    %33 = vector.broadcast %cst_23 : f32 to vector<8x1xf32>
    %34 = arith.subf %33, %31 : vector<8x1xf32>
    %c0_24 = arith.constant 0 : index
    %c0_25 = arith.constant 0 : index
    %35 = vector.load %arg11[%c0_24, %c0_25] : memref<8x1xf32, #tpu.memory_space<vmem>>, vector<8x1xf32>
    tpu.vector_store %arg11[%c0_24, %c0_25], %34 {strides = array<i32>} : memref<8x1xf32, #tpu.memory_space<vmem>>, vector<8x1xf32>,
    return
  }
  func.func @transform_0(%arg0: i32) -> (i32, i32) {
    %c0_i32 = arith.constant 0 : i32
    %c0_i32_0 = arith.constant 0 : i32
    %c0_i32_1 = arith.constant 0 : i32
    return %c0_i32, %c0_i32_0 : i32, i32
  }
  func.func @transform_1(%arg0: i32) -> (i32, i32) {
    %c0_i32 = arith.constant 0 : i32
    %c0_i32_0 = arith.constant 0 : i32
    return %arg0, %c0_i32 : i32, i32
  }
  func.func @transform_2(%arg0: i32) -> (i32, i32) {
    %c0_i32 = arith.constant 0 : i32
    %c0_i32_0 = arith.constant 0 : i32
    return %arg0, %c0_i32 : i32, i32
  }
  func.func @transform_3(%arg0: i32) -> (i32, i32) {
    %c0_i32 = arith.constant 0 : i32
    %c0_i32_0 = arith.constant 0 : i32
    %c0_i32_1 = arith.constant 0 : i32
    return %c0_i32, %c0_i32_0 : i32, i32
  }
  func.func @transform_4(%arg0: i32) -> (i32, i32) {
    %c0_i32 = arith.constant 0 : i32
    %c0_i32_0 = arith.constant 0 : i32
    %c0_i32_1 = arith.constant 0 : i32
    return %c0_i32, %c0_i32_0 : i32, i32
  }
  func.func @transform_5(%arg0: i32) -> (i32, i32) {
    %c0_i32 = arith.constant 0 : i32
    %c0_i32_0 = arith.constant 0 : i32
    %c0_i32_1 = arith.constant 0 : i32
    return %c0_i32, %c0_i32_0 : i32, i32
  }
  func.func @transform_6(%arg0: i32) -> (i32, i32) {
    %c0_i32 = arith.constant 0 : i32
    %c0_i32_0 = arith.constant 0 : i32
    %c0_i32_1 = arith.constant 0 : i32
    return %c0_i32, %c0_i32_0 : i32, i32
  }
  func.func @transform_7(%arg0: i32) -> (i32, i32) {
    %c0_i32 = arith.constant 0 : i32
    %c0_i32_0 = arith.constant 0 : i32
    %c0_i32_1 = arith.constant 0 : i32
    return %c0_i32, %c0_i32_0 : i32, i32
  }
  func.func @transform_8(%arg0: i32) -> (i32, i32) {
    %c0_i32 = arith.constant 0 : i32
    %c0_i32_0 = arith.constant 0 : i32
    %c0_i32_1 = arith.constant 0 : i32
    return %c0_i32, %c0_i32_0 : i32, i32
  }
  func.func @transform_9(%arg0: i32) -> (i32, i32) {
    %c0_i32 = arith.constant 0 : i32
    %c0_i32_0 = arith.constant 0 : i32
    return %arg0, %c0_i32 : i32, i32
  }
  func.func @transform_10(%arg0: i32) -> (i32, i32) {
    %c0_i32 = arith.constant 0 : i32
    %c0_i32_0 = arith.constant 0 : i32
    return %arg0, %c0_i32 : i32, i32
  }
}

</mosaic_0001>

<bundles_post_ra>
// kernel: tpu_custom_call.1
= control target key start
LH: loop header
LB: loop body
LE: loop exit
PB: predicated region body
PF: predicated region fallthrough
CT: control target
= control target key end

     0   :  { %17 = vsyncpa [#allocation4], 0  ;;  %s1279_s0 = inlined_call_operand.<no memory space> [shape: f32[1,1], index: 0, kind: input, shape index: {}]   ;;  %s1280_s1 = inlined_call_operand.hbm [shape: f32[8,256], index: 1, kind: input, shape index: {}]   ;;  %s1281_s2 = inlined_call_operand.hbm [shape: bf16[8,256], index: 2, kind: input, shape index: {}]   ;;  %s1282_s3 = inlined_call_operand.hbm [shape: bf16[256,128], index: 3, kind: input, shape index: {}]   ;;  %s1283_s4 = inlined_call_operand.vmem [shape: f32[1,128], index: 4, kind: input, shape index: {}]   ;;  %s1284_s5 = inlined_call_operand.vmem [shape: f32[1,128], index: 5, kind: input, shape index: {}]   ;;  %s1285_s6 = inlined_call_operand.hbm [shape: bf16[128,256], index: 6, kind: input, shape index: {}]   ;;  %s1286_s7 = inlined_call_operand.hbm [shape: bf16[256,256], index: 7, kind: input, shape index: {}]   ;;  %s1287_s8 = inlined_call_operand.vmem [shape: f32[1,256], index: 8, kind: input, shape index: {}]   ;;  %s1288_s9 = inlined_call_operand.hbm [shape: f32[8,256], index: 9, kind: output, shape index: {0}]   ;;  %s1289_s10 = inlined_call_operand.vmem [shape: f32[8,1], index: 10, kind: output, shape index: {1}]  }
   0x1   :  { %18 = vsyncpa [#allocation7], 0 }
   0x2   :  { %19 = vsyncpa [#allocation10], 0  ;;  %s39_s15 = sshll.u32 %s1281_s2, 4  ;;  %s40_s15 = int_to_ptr.hbm [resolvable:$true] %s39_s15 }
   0x3   :  { %20 = vsyncpa [#allocation5], 0  ;;  %s1181_s16 = smov [#allocation6]   ;;  %s66_s20 = sshll.u32 %s1285_s6, 4  ;;  %s67_s20 = int_to_ptr.hbm [resolvable:$true] %s66_s20 }
   0x4   :  { %s41_s17 = sshll.u32 %s1181_s16, 4  ;;  %s1182_s21 = smov [#allocation9]   ;;  %s42_s17 = int_to_ptr.vmem [resolvable:$true] %s41_s17 }
   0x5   :  { %44 = dma.hbm_to_vmem [thread:$0]  %s40_s15, 128, %s42_s17, [#allocation7]  }
   0x6   :  { %s68_s22 = sshll.u32 %s1182_s21, 4  ;;  %s1183_s23 = smov 128   ;;  %s69_s22 = int_to_ptr.vmem [resolvable:$true] %s68_s22 }
   0x7   :  { %s1184_s24 = smov 8   ;;  %s28_s2 = sshll.u32 %s1280_s1, 4  ;;  %s29_s2 = int_to_ptr.hbm [resolvable:$true] %s28_s2 }
   0x8   :  { %74 = dma.hbm_to_vmem [thread:$0]  %s67_s20, 2048, %s69_s22, [#allocation10], %s1183_s23, %s1183_s23, %s1184_s24  }
   0x9   :  { %s1185_s27 = smov [#allocation3]   ;;  %s49_s6 = sshll.u32 %s1282_s3, 4  ;;  %s50_s6 = int_to_ptr.hbm [resolvable:$true] %s49_s6 }
   0xa   :  { %s30_s28 = sshll.u32 %s1185_s27, 4  ;;  %s1186_s11 = smov [#allocation8]   ;;  %s31_s28 = int_to_ptr.vmem [resolvable:$true] %s30_s28 }
   0xb   :  { %33 = dma.hbm_to_vmem [thread:$0]  %s29_s2, 256, %s31_s28, [#allocation4]  }
   0xc   :  { %s51_s12 = sshll.u32 %s1186_s11, 4  ;;  %s1187_s13 = smov 64   ;;  %s52_s12 = int_to_ptr.vmem [resolvable:$true] %s51_s12 }
   0xd   :  { %s1188_s14 = smov 4   ;;  %s79_s1 = sshll.u32 %s1286_s7, 4  ;;  %s80_s1 = int_to_ptr.hbm [resolvable:$true] %s79_s1 }
   0xe   :  { %57 = dma.hbm_to_vmem [thread:$0]  %s50_s6, 2048, %s52_s12, [#allocation7], %s1187_s13, %s1187_s13, %s1188_s14  }
   0xf   :  { %s1189_s17 = smov [#allocation11]  }
  0x10   :  { %s81_s18 = sshll.u32 %s1189_s17, 4  ;;  %s82_s18 = int_to_ptr.vmem [resolvable:$true] %s81_s18 }
  0x11   :  { %87 = dma.hbm_to_vmem [thread:$0]  %s80_s1, 4096, %s82_s18, [#allocation10], %s1183_s23, %s1183_s23, %s1184_s24  }
  0x12   :  { %1173 = dma.done.wait [#allocation4], 256  }
  0x13   :  { %1174 = vsyncadd [#allocation4], 4294967040 }
  0x14   :  { %1175 = dma.done.wait [#allocation7], 2176  }
  0x15   :  { %1176 = vsyncadd [#allocation7], 4294965120 }
  0x16   :  { %1177 = dma.done.wait [#allocation10], 6144  }
  0x17   :  { %1178 = vsyncadd [#allocation10], 4294961152  ;;  %v959_v0 = vld [vmem:[#allocation8 + $0x38] sm:$0xff]  ;;  %v958_v2 = vld [vmem:[#allocation8 + $0x30] sm:$0xff]  ;;  %s680_s26 = sshll.u32 %s1288_s9, 4  ;;  %vm671_vm0 = vcmask 7168   ;;  %s681_s26 = int_to_ptr.hbm [resolvable:$true] %s680_s26 }
  0x18   :  { %v967_v1 = vld [vmem:[#allocation8 + $0x78] sm:$0xff]  ;;  %248 = vmatpush.bf16.msra.mxu0 %v959_v0  ;;  %v966_v3 = vld [vmem:[#allocation8 + $0x70] sm:$0xff]  ;;  %v957_v4 = vld [vmem:[#allocation8 + $0x28] sm:$0xff] }
  0x19   :  { %261 = vmatpush.bf16.msra.mxu1 %v967_v1  ;;  %v965_v5 = vld [vmem:[#allocation8 + $0x68] sm:$0xff]  ;;  %v818_v6 = vld [vmem:[#allocation9 + $0x70] sm:$0xf]  ;;  %v983_v7 = vld [vmem:[#allocation9 + $0x74] sm:$0xf0] }
  0x1a   :  { %v982_v8 = vld [vmem:[#allocation9 + $0x74] sm:$0xf]  ;;  %v819_v9 = vor.u32 %v983_v7, %v818_v6  ;;  %v820_v10 = vld [vmem:[#allocation9 + $0x78] sm:$0xf0]  ;;  %v810_v11 = vld [vmem:[#allocation9 + $0x60] sm:$0xf] }
  0x1b   :  { %v981_v12 = vld [vmem:[#allocation9 + $0x64] sm:$0xf0]  ;;  %v823_v13 = vor.u32 %v982_v8, %v820_v10  ;;  %v980_v14 = vld [vmem:[#allocation9 + $0x64] sm:$0xf]  ;;  %v812_v15 = vld [vmem:[#allocation9 + $0x68] sm:$0xf0] }
  0x1c   :  { %249 = vmatpush.bf16.msra.mxu0 %v958_v2  ;;  %v956_v16 = vld [vmem:[#allocation8 + $0x20] sm:$0xff]  ;;  %385 = vmatpush.bf16.msra.mxu2 %v819_v9  ;;  %v811_v17 = vor.u32 %v981_v12, %v810_v11  ;;  %v802_v19 = vld [vmem:[#allocation9 + $0x50] sm:$0xf]  ;;  %v979_v20 = vld [vmem:[#allocation9 + $0x54] sm:$0xf0]  ;;  %v815_v21 = vor.u32 %v980_v14, %v812_v15 }
  0x1d   :  { %262 = vmatpush.bf16.msra.mxu1 %v966_v3  ;;  %v964_v18 = vld [vmem:[#allocation8 + $0x60] sm:$0xff]  ;;  %398 = vmatpush.bf16.msra.mxu3 %v823_v13  ;;  %v978_v22 = vld [vmem:[#allocation9 + $0x54] sm:$0xf]  ;;  %v804_v23 = vld [vmem:[#allocation9 + $0x58] sm:$0xf0]  ;;  %v803_v25 = vor.u32 %v979_v20, %v802_v19 }
  0x1e   :  { %v955_v24 = vld [vmem:[#allocation8 + $0x18] sm:$0xff]  ;;  %v794_v27 = vld [vmem:[#allocation9 + $0x40] sm:$0xf]  ;;  %v977_v28 = vld [vmem:[#allocation9 + $0x44] sm:$0xf0]  ;;  %v807_v29 = vor.u32 %v978_v22, %v804_v23 }
  0x1f   :  { %v963_v26 = vld [vmem:[#allocation8 + $0x58] sm:$0xff]  ;;  %v976_v30 = vld [vmem:[#allocation9 + $0x44] sm:$0xf]  ;;  %v796_v31 = vld [vmem:[#allocation9 + $0x48] sm:$0xf0]  ;;  %v795_v33 = vor.u32 %v977_v28, %v794_v27 }
  0x20   :  { %250 = vmatpush.bf16.msra.mxu0 %v957_v4  ;;  %386 = vmatpush.bf16.msra.mxu2 %v811_v17  ;;  %v954_v32 = vld [vmem:[#allocation8 + $0x10] sm:$0xff]  ;;  %v975_v36 = vld [vmem:[#allocation9 + $0x34] sm:$0xf0]  ;;  %v799_v37 = vor.u32 %v976_v30, %v796_v31  ;;  %v788_v39 = vld [vmem:[#allocation9 + $0x38] sm:$0xf0] }
  0x21   :  { %263 = vmatpush.bf16.msra.mxu1 %v965_v5  ;;  %399 = vmatpush.bf16.msra.mxu3 %v815_v21  ;;  %v962_v34 = vld [vmem:[#allocation8 + $0x50] sm:$0xff]  ;;  %v953_v40 = vld [vmem:[#allocation8 + $0x8] sm:$0xff]  ;;  %v778_v43 = vld [vmem:[#allocation9 + $0x20] sm:$0xf] }
  0x22   :  { %v786_v35 = vld [vmem:[#allocation9 + $0x30] sm:$0xf]  ;;  %v974_v38 = vld [vmem:[#allocation9 + $0x34] sm:$0xf]  ;;  %v961_v42 = vld [vmem:[#allocation8 + $0x48] sm:$0xff] }
  0x23   :  { %v787_v41 = vor.u32 %v975_v36, %v786_v35  ;;  %v973_v44 = vld [vmem:[#allocation9 + $0x24] sm:$0xf0]  ;;  %v791_v45 = vor.u32 %v974_v38, %v788_v39  ;;  %v972_v46 = vld [vmem:[#allocation9 + $0x24] sm:$0xf]  ;;  %v780_v47 = vld [vmem:[#allocation9 + $0x28] sm:$0xf0] }
  0x24   :  { %251 = vmatpush.bf16.msra.mxu0 %v956_v16  ;;  %387 = vmatpush.bf16.msra.mxu2 %v803_v25  ;;  %v952_v48 = vld [vmem:[#allocation8] sm:$0xff]  ;;  %v779_v49 = vor.u32 %v973_v44, %v778_v43  ;;  %v111_v51 = vld [vmem:[#allocation3] sm:$0xff]  ;;  %v112_v52 = vld [vmem:[#allocation3 + $0x8] sm:$0xff]  ;;  %v783_v53 = vor.u32 %v972_v46, %v780_v47 }
  0x25   :  { %264 = vmatpush.bf16.msra.mxu1 %v964_v18  ;;  %400 = vmatpush.bf16.msra.mxu3 %v807_v29  ;;  %v960_v50 = vld [vmem:[#allocation8 + $0x40] sm:$0xff]  ;;  %v770_v54 = vld [vmem:[#allocation9 + $0x10] sm:$0xf]  ;;  %v971_v55 = vld [vmem:[#allocation9 + $0x14] sm:$0xf0]  ;;  %v114_v58 = vpack.c.bf16 %v111_v51, %v111_v51  ;;  %v115_v59 = vpack.c.bf16 %v112_v52, %v112_v52 }
  0x26   :  { %v970_v56 = vld [vmem:[#allocation9 + $0x14] sm:$0xf]  ;;  %v772_v57 = vld [vmem:[#allocation9 + $0x18] sm:$0xf0]  ;;  %v771_v60 = vor.u32 %v971_v55, %v770_v54  ;;  %v762_v62 = vld [vmem:[#allocation9] sm:$0xf] }
  0x27   :  { %v775_v61 = vor.u32 %v970_v56, %v772_v57  ;;  %v969_v63 = vld [vmem:[#allocation9 + $0x4] sm:$0xf0]  ;;  %v968_v0 = vld [vmem:[#allocation9 + $0x4] sm:$0xf]  ;;  %v764_v2 = vld [vmem:[#allocation9 + $0x8] sm:$0xf0] }
  0x28   :  { %252 = vmatpush.bf16.msra.mxu0 %v955_v24  ;;  %388 = vmatpush.bf16.msra.mxu2 %v795_v33  ;;  %v763_v1 = vor.u32 %v969_v63, %v762_v62  ;;  %v882_v3 = vld [vmem:[#allocation11 + $0x70] sm:$0xf]  ;;  %v999_v4 = vld [vmem:[#allocation11 + $0x74] sm:$0xf0]  ;;  %v767_v5 = vor.u32 %v968_v0, %v764_v2  ;;  %v998_v9 = vld [vmem:[#allocation11 + $0x74] sm:$0xf] }
  0x29   :  { %265 = vmatpush.bf16.msra.mxu1 %v963_v26  ;;  %401 = vmatpush.bf16.msra.mxu3 %v799_v37  ;;  %v883_v6 = vor.u32 %v999_v4, %v882_v3  ;;  %v946_v7 = vld [vmem:[#allocation11 + $0xf0] sm:$0xf]  ;;  %v1015_v8 = vld [vmem:[#allocation11 + $0xf4] sm:$0xf0]  ;;  %v884_v11 = vld [vmem:[#allocation11 + $0x78] sm:$0xf0] }
  0x2a   :  { %v947_v10 = vor.u32 %v1015_v8, %v946_v7  ;;  %v1014_v12 = vld [vmem:[#allocation11 + $0xf4] sm:$0xf]  ;;  %v887_v13 = vor.u32 %v998_v9, %v884_v11  ;;  %v948_v14 = vld [vmem:[#allocation11 + $0xf8] sm:$0xf0]  ;;  %v874_v16 = vld [vmem:[#allocation11 + $0x60] sm:$0xf] }
  0x2b   :  { %v951_v15 = vor.u32 %v1014_v12, %v948_v14  ;;  %v997_v17 = vld [vmem:[#allocation11 + $0x64] sm:$0xf0]  ;;  %v938_v18 = vld [vmem:[#allocation11 + $0xe0] sm:$0xf]  ;;  %v996_v21 = vld [vmem:[#allocation11 + $0x64] sm:$0xf] }
  0x2c   :  { %253 = vmatpush.bf16.msra.mxu0 %v954_v32  ;;  %389 = vmatpush.bf16.msra.mxu2 %v787_v41  ;;  %v875_v19 = vor.u32 %v997_v17, %v874_v16  ;;  %v1013_v20 = vld [vmem:[#allocation11 + $0xe4] sm:$0xf0]  ;;  %v876_v23 = vld [vmem:[#allocation11 + $0x68] sm:$0xf0]  ;;  %v1012_v24 = vld [vmem:[#allocation11 + $0xe4] sm:$0xf] }
  0x2d   :  { %266 = vmatpush.bf16.msra.mxu1 %v962_v34  ;;  %402 = vmatpush.bf16.msra.mxu3 %v791_v45  ;;  %v939_v22 = vor.u32 %v1013_v20, %v938_v18  ;;  %v940_v25 = vld [vmem:[#allocation11 + $0xe8] sm:$0xf0]  ;;  %v879_v26 = vor.u32 %v996_v21, %v876_v23  ;;  %v866_v28 = vld [vmem:[#allocation11 + $0x50] sm:$0xf]  ;;  %v995_v29 = vld [vmem:[#allocation11 + $0x54] sm:$0xf0] }
  0x2e   :  { %v943_v27 = vor.u32 %v1012_v24, %v940_v25  ;;  %v930_v30 = vld [vmem:[#allocation11 + $0xd0] sm:$0xf]  ;;  %v867_v31 = vor.u32 %v995_v29, %v866_v28  ;;  %v1011_v32 = vld [vmem:[#allocation11 + $0xd4] sm:$0xf0]  ;;  %v994_v33 = vld [vmem:[#allocation11 + $0x54] sm:$0xf] }
  0x2f   :  { %v868_v34 = vld [vmem:[#allocation11 + $0x58] sm:$0xf0]  ;;  %v931_v35 = vor.u32 %v1011_v32, %v930_v30  ;;  %v1010_v37 = vld [vmem:[#allocation11 + $0xd4] sm:$0xf]  ;;  %v858_v39 = vld [vmem:[#allocation11 + $0x40] sm:$0xf] }
  0x30   :  { %254 = vmatpush.bf16.msra.mxu0 %v953_v40  ;;  %390 = vmatpush.bf16.msra.mxu2 %v779_v49  ;;  %v871_v36 = vor.u32 %v994_v33, %v868_v34  ;;  %v932_v38 = vld [vmem:[#allocation11 + $0xd8] sm:$0xf0]  ;;  %v993_v41 = vld [vmem:[#allocation11 + $0x44] sm:$0xf0]  ;;  %v992_v46 = vld [vmem:[#allocation11 + $0x44] sm:$0xf] }
  0x31   :  { %267 = vmatpush.bf16.msra.mxu1 %v961_v42  ;;  %403 = vmatpush.bf16.msra.mxu3 %v783_v53  ;;  %v935_v40 = vor.u32 %v1010_v37, %v932_v38  ;;  %v922_v42 = vld [vmem:[#allocation11 + $0xc0] sm:$0xf]  ;;  %v1009_v43 = vld [vmem:[#allocation11 + $0xc4] sm:$0xf0]  ;;  %v859_v44 = vor.u32 %v993_v41, %v858_v39  ;;  %v860_v47 = vld [vmem:[#allocation11 + $0x48] sm:$0xf0]  ;;  %v275_v37 = vstv %s1279_s0 }
  0x32   :  { %v923_v45 = vor.u32 %v1009_v43, %v922_v42  ;;  %v863_v49 = vor.u32 %v992_v46, %v860_v47  ;;  %v850_v52 = vld [vmem:[#allocation11 + $0x30] sm:$0xf]  ;;  %v991_v53 = vld [vmem:[#allocation11 + $0x34] sm:$0xf0]  ;;  %v990_v57 = vld [vmem:[#allocation11 + $0x34] sm:$0xf] }
  0x33   :  { %v914_v54 = vld [vmem:[#allocation11 + $0xb0] sm:$0xf]  ;;  %v851_v55 = vor.u32 %v991_v53, %v850_v52  ;;  %v1007_v56 = vld [vmem:[#allocation11 + $0xb4] sm:$0xf0]  ;;  %v916_v62 = vld [vmem:[#allocation11 + $0xb8] sm:$0xf0] }
  0x34   :  { %255 = vmatpush.bf16.msra.mxu0 %v952_v48  ;;  %391 = vmatpush.bf16.msra.mxu2 %v771_v60  ;;  %v1008_v48 = vld [vmem:[#allocation11 + $0xc4] sm:$0xf]  ;;  %v842_v63 = vld [vmem:[#allocation11 + $0x20] sm:$0xf]  ;;  %v1005_v3 = vld [vmem:[#allocation11 + $0xa4] sm:$0xf0] }
  0x35   :  { %268 = vmatpush.bf16.msra.mxu1 %v960_v50  ;;  %404 = vmatpush.bf16.msra.mxu3 %v775_v61  ;;  %v924_v50 = vld [vmem:[#allocation11 + $0xc8] sm:$0xf0]  ;;  %v1006_v61 = vld [vmem:[#allocation11 + $0xb4] sm:$0xf]  ;;  %v906_v2 = vld [vmem:[#allocation11 + $0xa0] sm:$0xf] }
  0x36   :  { %v927_v51 = vor.u32 %v1008_v48, %v924_v50  ;;  %v919_v0 = vor.u32 %v1006_v61, %v916_v62  ;;  %v844_v7 = vld [vmem:[#allocation11 + $0x28] sm:$0xf0]  ;;  %v1004_v8 = vld [vmem:[#allocation11 + $0xa4] sm:$0xf]  ;;  %v834_v11 = vld [vmem:[#allocation11 + $0x10] sm:$0xf] }
  0x37   :  { %256 = vmatmul.bf16.vlgmr.msra.gmra.mxu0 %v114_v58  ;;  %v852_v58 = vld [vmem:[#allocation11 + $0x38] sm:$0xf0]  ;;  %v987_v12 = vld [vmem:[#allocation11 + $0x14] sm:$0xf0]  ;;  %v898_v14 = vld [vmem:[#allocation11 + $0x90] sm:$0xf] }
  0x38   :  { %269 = vmatmul.bf16.vlgmr.msra.gmra.mxu1 %v115_v59  ;;  %392 = vmatpush.bf16.msra.mxu2 %v763_v1  ;;  %v915_v59 = vor.u32 %v1007_v56, %v914_v54  ;;  %v855_v60 = vor.u32 %v990_v57, %v852_v58  ;;  %v989_v1 = vld [vmem:[#allocation11 + $0x24] sm:$0xf0]  ;;  %v986_v16 = vld [vmem:[#allocation11 + $0x14] sm:$0xf]  ;;  %v835_v17 = vor.u32 %v987_v12, %v834_v11  ;;  %v836_v18 = vld [vmem:[#allocation11 + $0x18] sm:$0xf0] }
  0x39   :  { %405 = vmatpush.bf16.msra.mxu3 %v767_v5  ;;  %610 = vmatpush.bf16.msrb.mxu0 %v883_v6  ;;  %v843_v4 = vor.u32 %v989_v1, %v842_v63  ;;  %v907_v5 = vor.u32 %v1005_v3, %v906_v2  ;;  %v988_v6 = vld [vmem:[#allocation11 + $0x24] sm:$0xf]  ;;  %v900_v20 = vld [vmem:[#allocation11 + $0x98] sm:$0xf0]  ;;  %v985_v23 = vld [vmem:[#allocation11 + $0x4] sm:$0xf0]  ;;  %v839_v24 = vor.u32 %v986_v16, %v836_v18 }
  0x3a   :  { %623 = vmatpush.bf16.msrb.mxu1 %v947_v10  ;;  %v847_v9 = vor.u32 %v988_v6, %v844_v7  ;;  %v908_v10 = vld [vmem:[#allocation11 + $0xa8] sm:$0xf0]  ;;  %v890_v25 = vld [vmem:[#allocation11 + $0x80] sm:$0xf]  ;;  %v984_v28 = vld [vmem:[#allocation11 + $0x4] sm:$0xf] }
  0x3b   :  { %v828_v29 = vld [vmem:[#allocation11 + $0x8] sm:$0xf0]  ;;  %v113_v30 = vld [vmem:[#allocation6] sm:$0xff]  ;;  %v1000_v32 = vld [vmem:[#allocation11 + $0x84] sm:$0xf] }
  0x3c   :  { %636 = vmatpush.bf16.msrb.mxu2 %v887_v13  ;;  %v911_v13 = vor.u32 %v1004_v8, %v908_v10  ;;  %v892_v33 = vld [vmem:[#allocation11 + $0x88] sm:$0xf0]  ;;  %v444_v34 = vunpack.c.l.b16 %v113_v30  ;;  %v831_v39 = vor.u32 %v984_v28, %v828_v29  ;;  %v1026_v42 = vld [vmem:[%s1283_s4] ss:$0 sm:$0xff] }
  0x3d   :  { %649 = vmatpush.bf16.msrb.mxu3 %v951_v15  ;;  %611 = vmatpush.bf16.msrb.mxu0 %v875_v19  ;;  %v1003_v15 = vld [vmem:[#allocation11 + $0x94] sm:$0xf0]  ;;  %v1002_v19 = vld [vmem:[#allocation11 + $0x94] sm:$0xf] }
  0x3e   :  { %624 = vmatpush.bf16.msrb.mxu1 %v939_v22  ;;  %v899_v21 = vor.u32 %v1003_v15, %v898_v14  ;;  %v826_v22 = vld [vmem:[#allocation11] sm:$0xf]  ;;  %v446_v41 = vpack.c.b16 %v444_v34, %v444_v34 }
  0x40   :  { %637 = vmatpush.bf16.msrb.mxu2 %v879_v26  ;;  %v1001_v26 = vld [vmem:[#allocation11 + $0x84] sm:$0xf0] }
  0x41   :  { %650 = vmatpush.bf16.msrb.mxu3 %v943_v27  ;;  %612 = vmatpush.bf16.msrb.mxu0 %v867_v31  ;;  %v903_v27 = vor.u32 %v1002_v19, %v900_v20  ;;  %v827_v31 = vor.u32 %v985_v23, %v826_v22  ;;  %v891_v38 = vor.u32 %v1001_v26, %v890_v25 }
  0x42   :  { %625 = vmatpush.bf16.msrb.mxu1 %v931_v35  ;;  %v445_v35 = vunpack.c.h.b16 %v113_v30 }
  0x44   :  { %638 = vmatpush.bf16.msrb.mxu2 %v871_v36  ;;  %v274_v36 = vld [vmem:[%s1284_s5] sm:$0x1]  ;;  %s1190_s5 = smov [#allocation12]  }
  0x45   :  { %651 = vmatpush.bf16.msrb.mxu3 %v935_v40  ;;  %613 = vmatpush.bf16.msrb.mxu0 %v859_v44  ;;  %v895_v40 = vor.u32 %v1000_v32, %v892_v33  ;;  %v276_v43 = vmul.f32 %v275_v37, %v274_v36  ;;  %v447_v44 = vpack.c.b16 %v445_v35, %v445_v35  ;;  %s678_s23 = sshll.u32 %s1190_s5, 4  ;;  %s679_s23 = int_to_ptr.vmem [resolvable:$true] %s678_s23 }
  0x46   :  { %626 = vmatpush.bf16.msrb.mxu1 %v923_v45 }
  0x47   :  { %v278_v48 = vperm.slane %v276_v43, 0 }
  0x48   :  { %639 = vmatpush.bf16.msrb.mxu2 %v863_v49 }
  0x49   :  { %652 = vmatpush.bf16.msrb.mxu3 %v927_v51  ;;  %614 = vmatpush.bf16.msrb.mxu0 %v851_v55 }
  0x4a   :  { %627 = vmatpush.bf16.msrb.mxu1 %v915_v59  ;;  %v299_v59 = vld [vmem:[%s1287_s8] sm:$0x3] }
  0x4b   :  { %v302_v61 = vperm.slane %v299_v59, 1 }
  0x4c   :  { %640 = vmatpush.bf16.msrb.mxu2 %v855_v60  ;;  %v301_v60 = vperm.slane %v299_v59, 0 }
  0x4d   :  { %653 = vmatpush.bf16.msrb.mxu3 %v919_v0  ;;  %615 = vmatpush.bf16.msrb.mxu0 %v843_v4 }
  0x4e   :  { %628 = vmatpush.bf16.msrb.mxu1 %v907_v5 }
  0x50   :  { %641 = vmatpush.bf16.msrb.mxu2 %v847_v9 }
  0x51   :  { %654 = vmatpush.bf16.msrb.mxu3 %v911_v13  ;;  %616 = vmatpush.bf16.msrb.mxu0 %v835_v17 }
  0x52   :  { %629 = vmatpush.bf16.msrb.mxu1 %v899_v21 }
  0x54   :  { %642 = vmatpush.bf16.msrb.mxu2 %v839_v24 }
  0x55   :  { %655 = vmatpush.bf16.msrb.mxu3 %v903_v27  ;;  %617 = vmatpush.bf16.msrb.mxu0 %v827_v31 }
  0x56   :  { %630 = vmatpush.bf16.msrb.mxu1 %v891_v38 }
  0x58   :  { %643 = vmatpush.bf16.msrb.mxu2 %v831_v39  ;;  %618 = vmatmul.bf16.vlgmr.msrb.gmra.mxu0 %v446_v41 }
  0x59   :  { %656 = vmatpush.bf16.msrb.mxu3 %v895_v40  ;;  %631 = vmatmul.bf16.vlgmr.msrb.gmra.mxu1 %v447_v44 }
  0xb4   :  { %v257_v45 = vpop.f32.mrf.mxu0 }
  0xb5   :  { %v270_v46 = vpop.f32.mrf.mxu1  ;;  %v258_v47 = vadd.f32 %v1026_v42, %v257_v45 }
  0xb7   :  { %v271_v49 = vadd.f32 %v270_v46, %v258_v47 }
  0xb9   :  { %v280_v50 = vadd.f32 %v278_v48, %v271_v49 }
  0xbb   :  { %1027 = vtanh.f32 %v280_v50 }
  0xbc   :  { %v259_v51 = vpop.f32.mrf.mxu0 }
  0xbd   :  { %v272_v52 = vpop.f32.mrf.mxu1 }
  0xc1   :  { %v1028_v53 = vpop.eup %1027 }
  0xc2   :  { %v282_v54 = vpack.c.bf16 %v1028_v53, %v1028_v53  ;;  %v662_v4 = vmul.f32 %v1028_v53, %v1028_v53 }
  0xc4   :  { %393 = vmatmul.bf16.vlgmr.msra.gmra.mxu2 %v282_v54  ;;  %406 = vmatmul.bf16.vlgmr.msra.gmra.mxu3 %v282_v54  ;;  %v663_v9 = vsub.f32 1.0, %v662_v4 }
  0xd4   :  { %644 = vmatmul.bf16.vlgmr.msrb.gmra.mxu2 %v446_v41  ;;  %657 = vmatmul.bf16.vlgmr.msrb.gmra.mxu3 %v447_v44 }
  0xd5   :  { %v619_v55 = vpop.f32.mrf.mxu0 }
  0xd6   :  { %v632_v56 = vpop.f32.mrf.mxu1 }
  0xd7   :  { %v633_v7 = vadd.f32 %v632_v56, %v619_v55 }
  0xdd   :  { %v621_v57 = vpop.f32.mrf.mxu0 }
  0xde   :  { %v634_v58 = vpop.f32.mrf.mxu1 }
 0x147   :  { %v394_v62 = vpop.f32.mrf.mxu2  ;;  %v407_v63 = vpop.f32.mrf.mxu3 }
 0x148   :  { %v395_v0 = vadd.f32 %v394_v62, %v301_v60  ;;  %v408_v1 = vadd.f32 %v407_v63, %v302_v61 }
 0x14a   :  { %668 = vst [vmem:[#allocation12] sm:$0xff] %v395_v0 }
 0x14b   :  { %669 = vst [vmem:[#allocation12 + $0x8] sm:$0xff] %v408_v1 }
 0x14c   :  { %683 = dma.vmem_to_hbm [thread:$0]  %s679_s23, 256, %s681_s26, [#allocation5]  }
 0x14f   :  { %v396_v2 = vpop.f32.mrf.mxu2  ;;  %v409_v3 = vpop.f32.mrf.mxu3 }
 0x157   :  { %v645_v5 = vpop.f32.mrf.mxu2  ;;  %v658_v6 = vpop.f32.mrf.mxu3 }
 0x158   :  { %v659_v8 = vadd.f32 %v658_v6, %v645_v5 }
 0x15a   :  { %v664_v10 = vmul.f32 %v663_v9, %v659_v8 }
 0x15c   :  { %v665_v11 = vmul.f32 %v664_v10, %v633_v7 }
 0x15e   :  { %666 = vadd.xlane.f32.xlu0 %v665_v11 }
 0x15f   :  { %v647_v12 = vpop.f32.mrf.mxu2  ;;  %v660_v13 = vpop.f32.mrf.mxu3 }
 0x1d1   :  { %v667_v14 = vpop.xlane.xlu0 %666 }
 0x1d2   :  { %v670_v15 = vsub.f32 0.0, %v667_v14 }
 0x1d4   :  { %672 = vst.msk [vmem:[%s1289_s10] sm:$0xff] %vm671_vm0, %v670_v15 }
 0x1d5   :  { %1179 = dma.done.wait [#allocation5], 256  }
 0x1d6   :  { %1180 = vsyncadd [#allocation5], 4294967040 }
 0x1d7   :  { %692 = vsyncpa [#allocation4], 1 }
 0x1d8   :  { %693 = vsyncpa [#allocation7], 1 }
 0x1d9   :  { %694 = vsyncpa [#allocation10], 1 }
 0x1da   :  { %695 = vsyncpa [#allocation5], 1 }

</bundles_post_ra>
